<compile_context>
chip_gen: v5e
topology: v5e:2x2
jax: 0.10.0
libtpu: 0.0.40
codegen_flags: <defaults>
</compile_context>

<pallas_src>
import functools

import jax
import jax.numpy as jnp
from jax.experimental import pallas as pl
from jax.experimental.pallas import tpu as pltpu


def _conv1x1_sigmoid_kernel(x_ref, w_ref, b_ref, o_ref):
    # x_ref: (C_in, TS)   w_ref: (C_out, C_in)   b_ref: (C_out, 1)
    # o_ref: (C_out, TS)  -- lane-dense output (TS is a large multiple of 128).
    acc = jnp.dot(w_ref[...], x_ref[...], preferred_element_type=jnp.float32)
    acc = acc + b_ref[...].astype(jnp.float32)          # broadcast over lanes
    # exp -> EUP slot; jax.nn.sigmoid keeps the divide off the VALU hot path.
    o_ref[...] = jax.nn.sigmoid(acc).astype(o_ref.dtype)


@functools.partial(jax.jit, static_argnames=("ts",))
def convolve_forward(x, weight, bias, ts=None):
    """Forward pass of `Convolve` (wrapped model == identity).

    x:      (N, C_in, D, H, W)  float32   (PyTorch NCDHW convention)
    weight: (C_out, C_in)       float32   (Conv3d weight squeezed over 1x1x1 kernel)
    bias:   (C_out,)            float32
    returns (N, C_out, D, H, W) float32
    """
    n, c_in, d, h, w = x.shape
    c_out = weight.shape[0]
    s = d * h * w

    # Zero-cost views: no transposes, no pad passes.
    x3 = x.reshape(n, c_in, s)
    b_col = bias.reshape(c_out, 1)

    # Spatial tile: big (>=0.5 MiB/step) but well under scoped VMEM on all
    # generations (v5e 16 MiB, v6e/v7x 32 MiB).  Per step, double-buffered:
    # (C_in + C_out) * TS * 4 B * 2  ~= 1.5 MiB at TS=16384 for C_in=4/C_out=8.
    if ts is None:
        target = 16384                      # multiple of 128 -> lane-aligned
        ts = s if s <= target else target   # full dim is always a legal block
    grid_s = pl.cdiv(s, ts)                 # ragged tail (if any) is masked

    out3 = pl.pallas_call(
        _conv1x1_sigmoid_kernel,
        out_shape=jax.ShapeDtypeStruct((n, c_out, s), x.dtype),
        grid_spec=pltpu.PrefetchScalarGridSpec(
            num_scalar_prefetch=0,
            grid=(n, grid_s),
            in_specs=[
                # Batch dim squeezed out of the kernel view.
                pl.BlockSpec((None, c_in, ts), lambda ni, si: (ni, 0, si)),
                pl.BlockSpec((c_out, c_in), lambda ni, si: (0, 0)),
                pl.BlockSpec((c_out, 1), lambda ni, si: (0, 0)),
            ],
            out_specs=pl.BlockSpec((None, c_out, ts), lambda ni, si: (ni, 0, si)),
        ),
        compiler_params=pltpu.CompilerParams(
            dimension_semantics=("parallel", "parallel")),
    )(x3, weight, b_col)

    # (N, C_out, S) -> NCDHW, zero data movement.
    return out3.reshape(n, c_out, d, h, w)


def init_params(key, in_channels, out_channels):
    """Deterministic init matching torch.nn.Conv3d default (kaiming uniform),
    with kernel_size=(1,1,1) so fan_in = in_channels."""
    k_w, k_b = jax.random.split(key)
    fan_in = in_channels * 1 * 1 * 1
    bound = 1.0 / (fan_in ** 0.5)
    weight = jax.random.uniform(
        k_w, (out_channels, in_channels), jnp.float32, -bound, bound)
    bias = jax.random.uniform(
        k_b, (out_channels,), jnp.float32, -bound, bound)
    return weight, bias


if __name__ == "__main__":
    key = jax.random.PRNGKey(0)
    k_x, k_p = jax.random.split(key)

    # Small 3D volume: N=2, C_in=4, D=4, H=8, W=8; C_out=8.
    N, C_IN, D, H, W = 2, 4, 4, 8, 8
    C_OUT = 8

    x = jax.random.normal(k_x, (N, C_IN, D, H, W), jnp.float32)
    weight, bias = init_params(k_p, C_IN, C_OUT)

    out = convolve_forward(x, weight, bias)
    out = jax.block_until_ready(out)

    # Sanity checks: shape and sigmoid range.
    assert out.shape == (N, C_OUT, D, H, W), out.shape
    assert bool(jnp.all(out > 0.0)) and bool(jnp.all(out < 1.0))

    # Cross-check against a plain-JAX reference of the same math.
    ref = jax.nn.sigmoid(
        jnp.einsum("ncdhw,oc->nodhw", x, weight,
                   precision=jax.lax.Precision.HIGHEST)
        + bias[None, :, None, None, None])
    assert bool(jnp.allclose(out, ref, atol=1e-5, rtol=1e-5))

    print("KERNEL_OK")
</pallas_src>

<mosaic_0001>
module attributes {stable_mosaic.version = 11 : i64} {
  func.func @_conv1x1_sigmoid_kernel(%arg0: i32, %arg1: i32, %arg2: memref<1x4x256xf32, #tpu.memory_space<vmem>>, %arg3: memref<8x4xf32, #tpu.memory_space<vmem>>, %arg4: memref<8x1xf32, #tpu.memory_space<vmem>>, %arg5: memref<1x8x256xf32, #tpu.memory_space<vmem>>) attributes {dimension_semantics = [#tpu.dimension_semantics<parallel>, #tpu.dimension_semantics<parallel>], iteration_bounds = array<i64: 2, 1>, scalar_prefetch = 0 : i64, scratch_operands = 0 : i64, tpu.core_type = #tpu.core_type<tc>, window_params = [{transform_indices = @transform_0, window_bounds = array<i64: 1, 4, 256>}, {pipeline_mode = #tpu.pipeline_mode<synchronous>, transform_indices = @transform_1, window_bounds = array<i64: 8, 4>}, {pipeline_mode = #tpu.pipeline_mode<synchronous>, transform_indices = @transform_2, window_bounds = array<i64: 8, 1>}, {transform_indices = @transform_3, window_bounds = array<i64: 1, 8, 256>}]} {
    %c0 = arith.constant 0 : index
    %c0_0 = arith.constant 0 : index
    %0 = vector.load %arg3[%c0, %c0_0] : memref<8x4xf32, #tpu.memory_space<vmem>>, vector<8x4xf32>
    %c0_1 = arith.constant 0 : index
    %c0_2 = arith.constant 0 : index
    %c0_3 = arith.constant 0 : index
    %1 = vector.load %arg2[%c0_1, %c0_2, %c0_3] : memref<1x4x256xf32, #tpu.memory_space<vmem>>, vector<1x4x256xf32>
    %2 = vector.shape_cast %1 : vector<1x4x256xf32> to vector<4x256xf32>
    %cst = arith.constant dense<0.000000e+00> : vector<8x256xf32>
    %3 = tpu.matmul %0, %2, %cst {dimension_numbers = #tpu.dot_dimension_numbers<[1], [0], [0], [1], [0, 0, 1, 1], [], []>} : vector<8x4xf32>, vector<4x256xf32>, vector<8x256xf32> -> vector<8x256xf32>
    %c0_4 = arith.constant 0 : index
    %c0_5 = arith.constant 0 : index
    %4 = vector.load %arg4[%c0_4, %c0_5] : memref<8x1xf32, #tpu.memory_space<vmem>>, vector<8x1xf32>
    %5 = vector.broadcast %4 : vector<8x1xf32> to vector<8x256xf32>
    %6 = arith.addf %3, %5 : vector<8x256xf32>
    %7 = arith.negf %6 : vector<8x256xf32>
    %8 = math.exp %7 : vector<8x256xf32>
    %cst_6 = arith.constant 1.000000e+00 : f32
    %9 = vector.broadcast %cst_6 : f32 to vector<8x256xf32>
    %10 = arith.addf %9, %8 : vector<8x256xf32>
    %11 = arith.divf %9, %10 : vector<8x256xf32>
    %c0_7 = arith.constant 0 : index
    %c0_8 = arith.constant 0 : index
    %c0_9 = arith.constant 0 : index
    %12 = vector.load %arg5[%c0_7, %c0_8, %c0_9] : memref<1x8x256xf32, #tpu.memory_space<vmem>>, vector<1x8x256xf32>
    %13 = vector.shape_cast %12 : vector<1x8x256xf32> to vector<8x256xf32>
    %14 = vector.shape_cast %11 : vector<8x256xf32> to vector<1x8x256xf32>
    tpu.vector_store %arg5[%c0_7, %c0_8, %c0_9], %14 {strides = array<i32>} : memref<1x8x256xf32, #tpu.memory_space<vmem>>, vector<1x8x256xf32>,
    return
  }
  func.func @transform_0(%arg0: i32, %arg1: i32) -> (i32, i32, i32) {
    %c0_i32 = arith.constant 0 : i32
    %c0_i32_0 = arith.constant 0 : i32
    return %arg0, %c0_i32, %arg1 : i32, i32, i32
  }
  func.func @transform_1(%arg0: i32, %arg1: i32) -> (i32, i32) {
    %c0_i32 = arith.constant 0 : i32
    %c0_i32_0 = arith.constant 0 : i32
    %c0_i32_1 = arith.constant 0 : i32
    return %c0_i32, %c0_i32_0 : i32, i32
  }
  func.func @transform_2(%arg0: i32, %arg1: i32) -> (i32, i32) {
    %c0_i32 = arith.constant 0 : i32
    %c0_i32_0 = arith.constant 0 : i32
    %c0_i32_1 = arith.constant 0 : i32
    return %c0_i32, %c0_i32_0 : i32, i32
  }
  func.func @transform_3(%arg0: i32, %arg1: i32) -> (i32, i32, i32) {
    %c0_i32 = arith.constant 0 : i32
    %c0_i32_0 = arith.constant 0 : i32
    return %arg0, %c0_i32, %arg1 : i32, i32, i32
  }
}

</mosaic_0001>

<bundles_post_ra>
// kernel: convolve_forward.1
= control target key start
LH: loop header
LB: loop body
LE: loop exit
PB: predicated region body
PF: predicated region fallthrough
CT: control target
= control target key end

     0   :  { %s496_s12 = smov 0   ;;  %s498_s13 = smov 0   ;;  %s539_s0 = inlined_call_operand.vmem [shape: f32[2,4,256], index: 0, kind: input, shape index: {}]   ;;  %s540_s1 = inlined_call_operand.vmem [shape: f32[8,4], index: 1, kind: input, shape index: {}]   ;;  %s541_s2 = inlined_call_operand.vmem [shape: f32[8,1], index: 2, kind: input, shape index: {}]   ;;  %s542_s3 = inlined_call_operand.vmem [shape: f32[2,8,256], index: 3, kind: output, shape index: {}]  }
   0x1   :  { %s500_s14 = smov 0  }
   0x2 LB: > { %s25_s15 = sadd.s32 1, %s469_s13  ;;  %p402_p0 = scmp.ge.s32.totalorder %s473_s14, 1  ;;  %s473_s14 = sphi %s500_s14, %s13_s14   ;;  %s469_s13 = sphi %s498_s13, %s544_s13   ;;  %s465_s12 = sphi %s496_s12, %s543_s12  }
   0x3   : > { %p27_p1 = scmp.ge.s32.totalorder %s25_s15, 2  ;;  %p158_p2 = scmp.lt.s32.totalorder %s473_s14, 3 }
   0x5   : > { %s546_s15 = smov (%p27_p1, %s25_s15), 0  ;;  %p159_p3 = pnand %p402_p0, %p158_p2 }
   0x6   : > { %p191_p4 = scmp.lt.s32.totalorder (!%p159_p3), %s465_s12, 1 }
   0x7   : > { %162 = sbr.rel (%p159_p3) target bundleno = 183 (0xb7), region = 32 }
   0xc   : > { %v212_v0 = vld [vmem:[%s541_s2] sm:$0xff]  ;;  %v475_v1 = vmov 0   ;;  %s548_s12 = smov (!%p191_p4, %s465_s12), 1  ;;  %vm226_vm0 = vcmask 1043456   ;;  %vm222_vm1 = vcmask 31744  }
   0xd   : > { %442 = vset.pattern.permute.xlu0 %v475_v1  ;;  %s415_s18 = sshll.u32 %s548_s12, 3  ;;  %v210_v3 = vld [vmem:[%s540_s1] sm:$0xff]  ;;  %s416_s24 = sshll.u32 %s548_s12, 4 }
   0xe   : > { %215 = vperm.xlu0 %442, %v212_v0   ;;  %s198_s21 = scalar_lea.vmem %s539_s0, %s415_s18  ;;  %s208_s27 = scalar_lea.vmem %s542_s3, %s416_s24 }
   0xf   : > { %v211_v2 = vld [vmem:[%s198_s21] sm:$0xff] }
  0x10   : > { %219 = vst [vmem:[#allocation1] ss:$2 sm:$0xff] %v211_v2 }
  0x17   : > { %v220_v4 = vld.sshfl [vmem:[#allocation1] sm:$0xff pattern:$0x75316420]  ;;  %v221_v5 = vld.sshfl [vmem:[#allocation1 + $0x8] sm:$0xff pattern:$0x75316420] }
  0x18   : > { %407 = vmatpush.msk.msra.mxu0 %vm226_vm0, %v220_v4  ;;  %409 = vmatpush.msk.msra.mxu1 %vm226_vm0, %v221_v5 }
  0x19   : > { %408 = vmatmul.msk.f32.vlgmr.msra.gmra.mxu0 %vm222_vm1, %v210_v3  ;;  %410 = vmatmul.msk.f32.vlgmr.msra.gmra.mxu1 %vm222_vm1, %v210_v3 }
  0x80   : > { %v216_v6 = vpop.permute.xlu0 %215 }
  0x96   : > { %v248_v7 = vpop.f32.mrf.mxu0  ;;  %v268_v8 = vpop.f32.mrf.mxu1 }
  0x97   : > { %v249_v9 = vadd.f32 %v248_v7, %v216_v6  ;;  %v269_v10 = vadd.f32 %v268_v8, %v216_v6 }
  0x99   : > { %v411_v11 = vmul.f32 -1.442695, %v249_v9  ;;  %v412_v12 = vmul.f32 -1.442695, %v269_v10 }
  0x9b   : > { %443 = vpow2.f32 %v411_v11 }
  0x9c   : > { %445 = vpow2.f32 %v412_v12 }
  0xa1   : > { %v444_v13 = vpop.eup %443 }
  0xa2   : > { %v446_v14 = vpop.eup %445  ;;  %v277_v15 = vadd.f32 1.0, %v444_v13 }
  0xa3   : > { %v278_v16 = vadd.f32 1.0, %v446_v14 }
  0xa4   : > { %447 = vrcp.f32 %v277_v15  ;;  %v290_v22 = vand.u32 2147483648, %v277_v15  ;;  %v288_v25 = vand.u32 2147483647, %v277_v15  ;;  %vm284_vm4 = vweird.f32 %v277_v15 }
  0xa5   : > { %449 = vrcp.f32 %v278_v16  ;;  %v305_v26 = vand.u32 2147483648, %v278_v16  ;;  %v303_v28 = vand.u32 2147483647, %v278_v16  ;;  %vm299_vm6 = vweird.f32 %v278_v16 }
  0xa6   : > { %v291_v30 = vor.u32 1.1754944e-38, %v290_v22  ;;  %vm289_vm7 = vcmp.eq.f32.partialorder %v288_v25, 8.507059e+37 }
  0xa7   : > { %v306_v33 = vor.u32 1.1754944e-38, %v305_v26  ;;  %vm304_vm9 = vcmp.eq.f32.partialorder %v303_v28, 8.507059e+37 }
  0xaa   : > { %v448_v17 = vpop.eup %447 }
  0xab   : > { %v450_v18 = vpop.eup %449  ;;  %v280_v19 = vmul.f32 %v448_v17, %v277_v15  ;;  %vm285_vm2 = vweird.f32 %v448_v17 }
  0xac   : > { %v295_v20 = vmul.f32 %v450_v18, %v278_v16  ;;  %vm300_vm3 = vweird.f32 %v450_v18  ;;  %vm286_vm5 = vmor %vm284_vm4, %vm285_vm2 }
  0xad   : > { %v281_v21 = vsub.f32 1.0, %v280_v19  ;;  %vm301_vm8 = vmor %vm299_vm6, %vm300_vm3 }
  0xae   : > { %v296_v23 = vsub.f32 1.0, %v295_v20 }
  0xaf   : > { %v282_v24 = vmul.f32 %v448_v17, %v281_v21 }
  0xb0   : > { %v297_v27 = vmul.f32 %v450_v18, %v296_v23 }
  0xb1   : > { %v283_v29 = vadd.f32 %v448_v17, %v282_v24 }
  0xb2   : > { %v298_v31 = vadd.f32 %v450_v18, %v297_v27 }
  0xb3   : > { %v287_v32 = vsel %vm286_vm5, %v448_v17, %v283_v29 }
  0xb4   : > { %v292_v34 = vsel %vm289_vm7, %v291_v30, %v287_v32  ;;  %v302_v35 = vsel %vm301_vm8, %v450_v18, %v298_v31 }
  0xb5   : > { %309 = vst [vmem:[%s208_s27] sm:$0xff] %v292_v34  ;;  %v307_v36 = vsel %vm304_vm9, %v306_v33, %v302_v35 }
  0xb6   : > { %310 = vst [vmem:[%s208_s27 + $0x8] sm:$0xff] %v307_v36 }
  0xb7 PF: > { %s13_s14 = sadd.s32 1, %s473_s14   ;;  %s543_s12 = smov %s469_s13 }
  0xb8   : > { %p10_p5 = scmp.ge.s32.totalorder %s13_s14, 4   ;;  %s544_s13 = smov %s546_s15 }
  0xba   :  { %12 = sbr.rel (!%p10_p5) target bundleno = 2 (0x2), region = 62 }

</bundles_post_ra>
